<compile_context>
chip_gen: v7x
topology: tpu7x:2x2x1
jax: 0.10.0
libtpu: 0.0.40
codegen_flags: <defaults>
</compile_context>

<pallas_src>
import jax
import jax.numpy as jnp
from jax.experimental import pallas as pl
from jax.experimental.pallas import tpu as pltpu

_LN_EPS = 1e-5


def _round_up(n, m):
    return ((n + m - 1) // m) * m


def _gelu(x):
    # TODO(synk): PyTorch nn.GELU default is the exact erf form; tanh approximation used
    # here (max abs diff ~3e-3) since erf has no guaranteed Mosaic lowering.
    c = jnp.float32(0.7978845608028654)  # sqrt(2/pi)
    return 0.5 * x * (1.0 + jnp.tanh(c * (x + 0.044715 * x * x * x)))


def _layer_norm(x, gamma, beta):
    mu = jnp.mean(x, axis=-1, keepdims=True)
    d = x - mu
    var = jnp.mean(d * d, axis=-1, keepdims=True)
    return d * jax.lax.rsqrt(var + _LN_EPS) * gamma + beta


def _stage(x_bf16, w_ref, b_ref, g_ref, be_ref):
    """GELU(LayerNorm(x @ w + b)); bf16 matmul operands, f32 accumulation + f32 LN/GELU."""
    y = jnp.dot(x_bf16, w_ref[...], preferred_element_type=jnp.float32) + b_ref[...]
    y = _layer_norm(y, g_ref[...], be_ref[...])
    return _gelu(y)


# ----------------------------- Pallas kernels ------------------------------

def conv_ln_gelu_kernel(x_ref, w_ref, b_ref, g_ref, be_ref, o_ref):
    o_ref[...] = _stage(x_ref[...], w_ref, b_ref, g_ref, be_ref).astype(o_ref.dtype)


def conv_dense_kernel(x_ref,
                      wc_ref, bc_ref, gc_ref, bec_ref,
                      w1_ref, b1_ref, g1_ref, be1_ref,
                      w2_ref, b2_ref, g2_ref, be2_ref,
                      o_ref):
    """Fused: Conv2(im2col matmul)+LN+GELU -> Dense1+LN+GELU -> Dense2+LN+GELU."""
    y = _stage(x_ref[...], wc_ref, bc_ref, gc_ref, bec_ref)
    y = _stage(y.astype(jnp.bfloat16), w1_ref, b1_ref, g1_ref, be1_ref)
    y = _stage(y.astype(jnp.bfloat16), w2_ref, b2_ref, g2_ref, be2_ref)
    o_ref[...] = y.astype(o_ref.dtype)


def gi_first_kernel(x_ref, wf_ref, wb_ref, bf_ref, bb_ref, gif_ref, gib_ref):
    """Hoisted GRU input projection (layer 0): gi = x @ W_ih + b_ih for both directions."""
    x = x_ref[...]
    gif_ref[...] = (jnp.dot(x, wf_ref[...], preferred_element_type=jnp.float32)
                    + bf_ref[...]).astype(gif_ref.dtype)
    gib_ref[...] = (jnp.dot(x, wb_ref[...], preferred_element_type=jnp.float32)
                    + bb_ref[...]).astype(gib_ref.dtype)


def gi_next_kernel(xf_ref, xb_ref,
                   wft_ref, wfb_ref, wbt_ref, wbb_ref,
                   bf_ref, bb_ref, gif_ref, gib_ref):
    """Hoisted GRU input projection (layers >= 1). Input = concat(out_f, out_b) is never
    materialized: W_ih is pre-split into top/bottom halves."""
    xf = xf_ref[...]
    xb = xb_ref[...]
    gif_ref[...] = (jnp.dot(xf, wft_ref[...], preferred_element_type=jnp.float32)
                    + jnp.dot(xb, wfb_ref[...], preferred_element_type=jnp.float32)
                    + bf_ref[...]).astype(gif_ref.dtype)
    gib_ref[...] = (jnp.dot(xf, wbt_ref[...], preferred_element_type=jnp.float32)
                    + jnp.dot(xb, wbb_ref[...], preferred_element_type=jnp.float32)
                    + bb_ref[...]).astype(gib_ref.dtype)


def head_kernel(xf_ref, xb_ref, g_ref, be_ref, wt_ref, wbo_ref, b_ref, o_ref):
    """Final LayerNorm(2H) + GELU + Linear (output padded to a 128 lane multiple).
    LN statistics computed jointly over the two direction halves without a concat."""
    xf = xf_ref[...].astype(jnp.float32)
    xb = xb_ref[...].astype(jnp.float32)
    h = xf.shape[-1]
    d = 2 * h
    mu = (jnp.sum(xf, axis=-1, keepdims=True) + jnp.sum(xb, axis=-1, keepdims=True)) / d
    df = xf - mu
    db = xb - mu
    var = (jnp.sum(df * df, axis=-1, keepdims=True)
           + jnp.sum(db * db, axis=-1, keepdims=True)) / d
    rstd = jax.lax.rsqrt(var + _LN_EPS)
    g = g_ref[...]
    be = be_ref[...]
    yf = _gelu(df * rstd * g[:, :h] + be[:, :h])
    yb = _gelu(db * rstd * g[:, h:] + be[:, h:])
    o_ref[...] = (jnp.dot(yf.astype(jnp.bfloat16), wt_ref[...],
                          preferred_element_type=jnp.float32)
                  + jnp.dot(yb.astype(jnp.bfloat16), wbo_ref[...],
                            preferred_element_type=jnp.float32)
                  + b_ref[...]).astype(o_ref.dtype)


def gru_layer_kernel(gif_ref, gib_ref, whhf_ref, whhb_ref, bhhf_ref, bhhb_ref,
                     h0f_ref, h0b_ref,
                     outf_ref, outb_ref, hnf_ref, hnb_ref,
                     hf_scr, hb_scr):
    """One bidirectional GRU layer. Grid = time steps (sequential). Both directions per step:
    forward reads gi at t, backward reads gi at T-1-t. Only h @ W_hh remains per step
    (the input projection was hoisted). PyTorch gate order: r, z, n."""
    t = pl.program_id(0)
    nt = pl.num_programs(0)
    hs = whhf_ref.shape[0]

    @pl.when(t == 0)
    def _():
        hf_scr[...] = h0f_ref[...]
        hb_scr[...] = h0b_ref[...]

    def step(gi, h, whh_ref, bhh_ref):
        gh = jnp.dot(h.astype(jnp.bfloat16), whh_ref[...],
                     preferred_element_type=jnp.float32) + bhh_ref[...]
        r = jax.nn.sigmoid(gi[:, 0 * hs:1 * hs] + gh[:, 0 * hs:1 * hs])
        z = jax.nn.sigmoid(gi[:, 1 * hs:2 * hs] + gh[:, 1 * hs:2 * hs])
        n = jnp.tanh(gi[:, 2 * hs:3 * hs] + r * gh[:, 2 * hs:3 * hs])
        return (1.0 - z) * n + z * h

    hf = step(gif_ref[0], hf_scr[...], whhf_ref, bhhf_ref)
    hb = step(gib_ref[0], hb_scr[...], whhb_ref, bhhb_ref)
    hf_scr[...] = hf
    hb_scr[...] = hb
    outf_ref[0] = hf.astype(outf_ref.dtype)
    outb_ref[0] = hb.astype(outb_ref.dtype)

    @pl.when(t == nt - 1)
    def _():
        hnf_ref[...] = hf.astype(hnf_ref.dtype)
        hnb_ref[...] = hb.astype(hnb_ref.dtype)


# ----------------------------- pallas_call wrappers -------------------------

def _rowwise_pallas_call(kernel, row_inputs, const_inputs, out_dims, out_dtypes):
    """Row-tiled pallas_call: grid over row tiles, weights/bias broadcast, 'parallel' axis."""
    n = row_inputs[0].shape[0]
    tm = min(512, _round_up(n, 8))
    grid = (pl.cdiv(n, tm),)
    in_specs = ([pl.BlockSpec((tm, x.shape[1]), lambda i: (i, 0)) for x in row_inputs]
                + [pl.BlockSpec(c.shape, lambda i: (0, 0)) for c in const_inputs])
    out_specs = [pl.BlockSpec((tm, d), lambda i: (i, 0)) for d in out_dims]
    out_shape = [jax.ShapeDtypeStruct((n, d), dt) for d, dt in zip(out_dims, out_dtypes)]
    return pl.pallas_call(
        kernel,
        grid_spec=pltpu.PrefetchScalarGridSpec(
            num_scalar_prefetch=0, grid=grid,
            in_specs=in_specs, out_specs=out_specs),
        out_shape=out_shape,
        compiler_params=pltpu.CompilerParams(dimension_semantics=("parallel",)),
    )(*row_inputs, *const_inputs)


def gru_layer(gi_f, gi_b, whh_f, whh_b, bhh_f, bhh_b, h0_f, h0_b):
    T, B, G = gi_f.shape
    H = whh_f.shape[0]
    grid_spec = pltpu.PrefetchScalarGridSpec(
        num_scalar_prefetch=0,
        grid=(T,),
        in_specs=[
            pl.BlockSpec((1, B, G), lambda t: (t, 0, 0)),            # gi forward @ t
            pl.BlockSpec((1, B, G), lambda t: (T - 1 - t, 0, 0)),    # gi backward @ T-1-t
            pl.BlockSpec((H, G), lambda t: (0, 0)),                  # W_hh fwd (bf16)
            pl.BlockSpec((H, G), lambda t: (0, 0)),                  # W_hh bwd (bf16)
            pl.BlockSpec((1, G), lambda t: (0, 0)),                  # b_hh fwd
            pl.BlockSpec((1, G), lambda t: (0, 0)),                  # b_hh bwd
            pl.BlockSpec((B, H), lambda t: (0, 0)),                  # h0 fwd
            pl.BlockSpec((B, H), lambda t: (0, 0)),                  # h0 bwd
        ],
        out_specs=[
            pl.BlockSpec((1, B, H), lambda t: (t, 0, 0)),            # out fwd
            pl.BlockSpec((1, B, H), lambda t: (T - 1 - t, 0, 0)),    # out bwd
            pl.BlockSpec((B, H), lambda t: (0, 0)),                  # hn fwd
            pl.BlockSpec((B, H), lambda t: (0, 0)),                  # hn bwd
        ],
        scratch_shapes=[pltpu.VMEM((B, H), jnp.float32),
                        pltpu.VMEM((B, H), jnp.float32)],
    )
    return pl.pallas_call(
        gru_layer_kernel,
        grid_spec=grid_spec,
        out_shape=(jax.ShapeDtypeStruct((T, B, H), jnp.bfloat16),
                   jax.ShapeDtypeStruct((T, B, H), jnp.bfloat16),
                   jax.ShapeDtypeStruct((B, H), jnp.float32),
                   jax.ShapeDtypeStruct((B, H), jnp.float32)),
        compiler_params=pltpu.CompilerParams(
            dimension_semantics=("arbitrary",),
            # Headroom for production hidden_size=1024 bf16 W_hh weights (re-derive per gen).
            vmem_limit_bytes=48 * 1024 * 1024,
        ),
    )(gi_f, gi_b, whh_f, whh_b, bhh_f, bhh_b, h0_f, h0_b)


def bidirectional_gru(x_tbd, gru_params, hidden):
    """x_tbd: (T, B, 128) bf16 time-major. Returns out_f, out_b (T, B, H) and hn."""
    T, B, _ = x_tbd.shape
    out_f = out_b = None
    hn = []
    for l, p in enumerate(gru_params):
        if l == 0:
            x2d = x_tbd.reshape(T * B, x_tbd.shape[-1])
            gi_f, gi_b = _rowwise_pallas_call(
                gi_first_kernel, [x2d],
                [p["wih_f"], p["wih_b"], p["bih_f"], p["bih_b"]],
                out_dims=[p["wih_f"].shape[1]] * 2, out_dtypes=[jnp.float32] * 2)
        else:
            xf2d = out_f.reshape(T * B, out_f.shape[-1])
            xb2d = out_b.reshape(T * B, out_b.shape[-1])
            gi_f, gi_b = _rowwise_pallas_call(
                gi_next_kernel, [xf2d, xb2d],
                [p["wih_f_t"], p["wih_f_b"], p["wih_b_t"], p["wih_b_b"],
                 p["bih_f"], p["bih_b"]],
                out_dims=[p["wih_f_t"].shape[1]] * 2, out_dtypes=[jnp.float32] * 2)
        G = gi_f.shape[-1]
        gi_f = gi_f.reshape(T, B, G)
        gi_b = gi_b.reshape(T, B, G)
        out_f, out_b, hn_f, hn_b = gru_layer(
            gi_f, gi_b, p["whh_f"], p["whh_b"], p["bhh_f"], p["bhh_b"],
            hidden[2 * l], hidden[2 * l + 1])
        # inter-layer dropout(p=0.15) is identity at inference
        hn.extend([hn_f, hn_b])
    return out_f, out_b, jnp.stack(hn, axis=0)


# ----------------------------- JAX glue ------------------------------------

def im2col_1d(x_btc, k, stride, pad):
    """(B, T, C) -> (B*T_out, k*C); matches Conv1d with PyTorch weight (Cout, Cin, k)."""
    b, t, c = x_btc.shape
    xp = jnp.pad(x_btc, ((0, 0), (pad, pad), (0, 0)))
    t_out = (t + 2 * pad - k) // stride + 1
    cols = [xp[:, i:i + (t_out - 1) * stride + 1:stride, :] for i in range(k)]
    cols = jnp.concatenate(cols, axis=-1)          # (B, T_out, k*C), index = i*C + ci
    return cols.reshape(b * t_out, k * c), t_out


def init_params(key, n_feats=128, hidden_size=128, num_classes=29, num_layers=2):
    keys = jax.random.split(key, 64)
    ki = iter(keys)

    def norm(shape, scale=0.05):
        return scale * jax.random.normal(next(ki), shape, dtype=jnp.float32)

    def bf16(a):
        return a.astype(jnp.bfloat16)

    p = {}
    # conv1: PyTorch weight (Cout, Cin, 3) -> im2col matrix (3*Cin, Cout), stored bf16
    w1 = norm((n_feats, n_feats, 3))
    p["conv1_w"] = bf16(jnp.transpose(w1, (2, 1, 0)).reshape(3 * n_feats, n_feats))
    p["conv1_b"] = norm((1, n_feats))
    p["ln_cnn1_g"] = jnp.ones((1, n_feats), jnp.float32)
    p["ln_cnn1_b"] = jnp.zeros((1, n_feats), jnp.float32)
    # conv2: kernel 5, stride 2
    w2 = norm((n_feats, n_feats, 5))
    p["conv2_w"] = bf16(jnp.transpose(w2, (2, 1, 0)).reshape(5 * n_feats, n_feats))
    p["conv2_b"] = norm((1, n_feats))
    p["ln_cnn2_g"] = jnp.ones((1, n_feats), jnp.float32)
    p["ln_cnn2_b"] = jnp.zeros((1, n_feats), jnp.float32)
    # dense: Linear(n_feats,128)+LN+GELU, Linear(128,128)+LN+GELU
    p["d1_w"] = bf16(norm((n_feats, 128))); p["d1_b"] = norm((1, 128))
    p["dln1_g"] = jnp.ones((1, 128), jnp.float32); p["dln1_b"] = jnp.zeros((1, 128), jnp.float32)
    p["d2_w"] = bf16(norm((128, 128))); p["d2_b"] = norm((1, 128))
    p["dln2_g"] = jnp.ones((1, 128), jnp.float32); p["dln2_b"] = jnp.zeros((1, 128), jnp.float32)
    # bidirectional GRU (weights stored transposed: (Din, 3H), gate order r,z,n, bf16)
    H = hidden_size
    gru = []
    for l in range(num_layers):
        din = 128 if l == 0 else 2 * H
        layer = {}
        for d in ("f", "b"):
            wih = norm((din, 3 * H))
            if l == 0:
                layer[f"wih_{d}"] = bf16(wih)
            else:
                layer[f"wih_{d}_t"] = bf16(wih[:H])      # multiplies out_f of previous layer
                layer[f"wih_{d}_b"] = bf16(wih[H:])      # multiplies out_b of previous layer
            layer[f"whh_{d}"] = bf16(norm((H, 3 * H)))
            layer[f"bih_{d}"] = norm((1, 3 * H))
            layer[f"bhh_{d}"] = norm((1, 3 * H))
        gru.append(layer)
    p["gru"] = gru
    # final LayerNorm(2H) + Linear(2H, num_classes) -- classifier padded to 128 lanes
    p["ln2_g"] = jnp.ones((1, 2 * H), jnp.float32)
    p["ln2_b"] = jnp.zeros((1, 2 * H), jnp.float32)
    c_pad = _round_up(num_classes, 128)
    fc_w = norm((2 * H, num_classes))
    fc_w_pad = jnp.zeros((2 * H, c_pad), jnp.float32).at[:, :num_classes].set(fc_w)
    p["fc_w_t"] = bf16(fc_w_pad[:H])
    p["fc_w_b"] = bf16(fc_w_pad[H:])
    fc_b = norm((1, num_classes))
    p["fc_b"] = jnp.zeros((1, c_pad), jnp.float32).at[:, :num_classes].set(fc_b)
    return p


def speech_recognition_forward(x, hidden, params, *, num_classes=29):
    # x: (B, 1, n_feats, T)
    b = x.shape[0]
    n_feats = x.shape[2]
    hidden = hidden.astype(jnp.float32)
    x = jnp.squeeze(x, axis=1)                               # (B, n_feats, T)
    x = jnp.transpose(x, (0, 2, 1)).astype(jnp.bfloat16)     # (B, T, n_feats) channels-last

    # cnn block 1: Conv1d(k=3,s=1,p=1) + LN + GELU (keep_shape=True)
    cols, t1 = im2col_1d(x, 3, 1, 1)
    y = _rowwise_pallas_call(
        conv_ln_gelu_kernel, [cols],
        [params["conv1_w"], params["conv1_b"], params["ln_cnn1_g"], params["ln_cnn1_b"]],
        out_dims=[n_feats], out_dtypes=[jnp.bfloat16])[0]
    y = y.reshape(b, t1, n_feats)

    # cnn block 2 (Conv1d k=5,s=2,p=2 + LN + GELU) fused with both dense blocks
    cols, t2 = im2col_1d(y, 5, 2, 2)
    y = _rowwise_pallas_call(
        conv_dense_kernel, [cols],
        [params["conv2_w"], params["conv2_b"], params["ln_cnn2_g"], params["ln_cnn2_b"],
         params["d1_w"], params["d1_b"], params["dln1_g"], params["dln1_b"],
         params["d2_w"], params["d2_b"], params["dln2_g"], params["dln2_b"]],
        out_dims=[128], out_dtypes=[jnp.bfloat16])[0]        # (B*T2, 128)

    # time-major for the GRU: x.transpose(0, 1) (single small XLA transpose)
    y = jnp.transpose(y.reshape(b, t2, 128), (1, 0, 2))      # (T2, B, 128)

    out_f, out_b, hn = bidirectional_gru(y, params["gru"], hidden)

    # final LayerNorm(2H) + GELU + Linear (padded, then sliced back to num_classes)
    tt, bb, hh = out_f.shape
    logits = _rowwise_pallas_call(
        head_kernel, [out_f.reshape(tt * bb, hh), out_b.reshape(tt * bb, hh)],
        [params["ln2_g"], params["ln2_b"], params["fc_w_t"], params["fc_w_b"], params["fc_b"]],
        out_dims=[params["fc_b"].shape[1]], out_dtypes=[jnp.float32])[0]
    logits = logits.reshape(tt, bb, -1)[:, :, :num_classes]
    return logits, hn


if __name__ == "__main__":
    key = jax.random.PRNGKey(0)
    k_in, k_par = jax.random.split(key)

    B, N_FEATS, T = 2, 128, 16
    HIDDEN, LAYERS, CLASSES = 128, 2, 29      # hidden_size reduced from 1024 for a small test

    x = jax.random.normal(k_in, (B, 1, N_FEATS, T), dtype=jnp.float32)
    hidden = jnp.zeros((LAYERS * 2, B, HIDDEN), jnp.float32)  # _init_hidden(batch_size)
    params = init_params(k_par, n_feats=N_FEATS, hidden_size=HIDDEN,
                         num_classes=CLASSES, num_layers=LAYERS)

    logits, hn = speech_recognition_forward(x, hidden, params, num_classes=CLASSES)
    jax.block_until_ready((logits, hn))

    assert logits.shape == (8, B, CLASSES)      # T'=8 after the stride-2 conv
    assert hn.shape == (LAYERS * 2, B, HIDDEN)
    assert bool(jnp.all(jnp.isfinite(logits))) and bool(jnp.all(jnp.isfinite(hn)))
    print("KERNEL_OK")
</pallas_src>

<mosaic_0001>
module attributes {stable_mosaic.version = 11 : i64} {
  func.func @conv_ln_gelu_kernel(%arg0: i32, %arg1: memref<32x384xbf16, #tpu.memory_space<vmem>>, %arg2: memref<384x128xbf16, #tpu.memory_space<vmem>>, %arg3: memref<1x128xf32, #tpu.memory_space<vmem>>, %arg4: memref<1x128xf32, #tpu.memory_space<vmem>>, %arg5: memref<1x128xf32, #tpu.memory_space<vmem>>, %arg6: memref<32x128xbf16, #tpu.memory_space<vmem>>) attributes {dimension_semantics = [#tpu.dimension_semantics<parallel>], iteration_bounds = array<i64: 1>, scalar_prefetch = 0 : i64, scratch_operands = 0 : i64, tpu.core_type = #tpu.core_type<tc>, window_params = [{transform_indices = @transform_0, window_bounds = array<i64: 32, 384>}, {pipeline_mode = #tpu.pipeline_mode<synchronous>, transform_indices = @transform_1, window_bounds = array<i64: 384, 128>}, {pipeline_mode = #tpu.pipeline_mode<synchronous>, transform_indices = @transform_2, window_bounds = array<i64: 1, 128>}, {pipeline_mode = #tpu.pipeline_mode<synchronous>, transform_indices = @transform_3, window_bounds = array<i64: 1, 128>}, {pipeline_mode = #tpu.pipeline_mode<synchronous>, transform_indices = @transform_4, window_bounds = array<i64: 1, 128>}, {transform_indices = @transform_5, window_bounds = array<i64: 32, 128>}]} {
    %c0 = arith.constant 0 : index
    %c0_0 = arith.constant 0 : index
    %0 = vector.load %arg1[%c0, %c0_0] : memref<32x384xbf16, #tpu.memory_space<vmem>>, vector<32x384xbf16>
    %c0_1 = arith.constant 0 : index
    %c0_2 = arith.constant 0 : index
    %1 = vector.load %arg2[%c0_1, %c0_2] : memref<384x128xbf16, #tpu.memory_space<vmem>>, vector<384x128xbf16>
    %cst = arith.constant dense<0.000000e+00> : vector<32x128xf32>
    %2 = tpu.matmul %0, %1, %cst {dimension_numbers = #tpu.dot_dimension_numbers<[1], [0], [0], [1], [0, 0, 1, 1], [], []>} : vector<32x384xbf16>, vector<384x128xbf16>, vector<32x128xf32> -> vector<32x128xf32>
    %c0_3 = arith.constant 0 : index
    %c0_4 = arith.constant 0 : index
    %3 = vector.load %arg3[%c0_3, %c0_4] : memref<1x128xf32, #tpu.memory_space<vmem>>, vector<1x128xf32>
    %4 = vector.broadcast %3 : vector<1x128xf32> to vector<32x128xf32>
    %5 = arith.addf %2, %4 : vector<32x128xf32>
    %c0_5 = arith.constant 0 : index
    %c0_6 = arith.constant 0 : index
    %6 = vector.load %arg4[%c0_5, %c0_6] : memref<1x128xf32, #tpu.memory_space<vmem>>, vector<1x128xf32>
    %c0_7 = arith.constant 0 : index
    %c0_8 = arith.constant 0 : index
    %7 = vector.load %arg5[%c0_7, %c0_8] : memref<1x128xf32, #tpu.memory_space<vmem>>, vector<1x128xf32>
    %cst_9 = arith.constant dense<0.000000e+00> : vector<32xf32>
    %8 = vector.multi_reduction <add>, %5, %cst_9 [1] : vector<32x128xf32> to vector<32xf32>
    %9 = vector.shape_cast %8 : vector<32xf32> to vector<32x1xf32>
    %cst_10 = arith.constant 1.280000e+02 : f32
    %10 = vector.broadcast %cst_10 : f32 to vector<32x1xf32>
    %11 = arith.divf %9, %10 : vector<32x1xf32>
    %12 = vector.broadcast %11 : vector<32x1xf32> to vector<32x128xf32>
    %13 = arith.subf %5, %12 : vector<32x128xf32>
    %14 = arith.mulf %13, %13 : vector<32x128xf32>
    %cst_11 = arith.constant dense<0.000000e+00> : vector<32xf32>
    %15 = vector.multi_reduction <add>, %14, %cst_11 [1] : vector<32x128xf32> to vector<32xf32>
    %16 = vector.shape_cast %15 : vector<32xf32> to vector<32x1xf32>
    %cst_12 = arith.constant 1.280000e+02 : f32
    %17 = vector.broadcast %cst_12 : f32 to vector<32x1xf32>
    %18 = arith.divf %16, %17 : vector<32x1xf32>
    %cst_13 = arith.constant 9.99999974E-6 : f32
    %19 = vector.broadcast %cst_13 : f32 to vector<32x1xf32>
    %20 = arith.addf %18, %19 : vector<32x1xf32>
    %21 = math.rsqrt %20 : vector<32x1xf32>
    %22 = vector.broadcast %21 : vector<32x1xf32> to vector<32x128xf32>
    %23 = arith.mulf %13, %22 : vector<32x128xf32>
    %24 = vector.broadcast %6 : vector<1x128xf32> to vector<32x128xf32>
    %25 = arith.mulf %23, %24 : vector<32x128xf32>
    %26 = vector.broadcast %7 : vector<1x128xf32> to vector<32x128xf32>
    %27 = arith.addf %25, %26 : vector<32x128xf32>
    %cst_14 = arith.constant 5.000000e-01 : f32
    %28 = vector.broadcast %cst_14 : f32 to vector<32x128xf32>
    %29 = arith.mulf %28, %27 : vector<32x128xf32>
    %cst_15 = arith.constant 4.471500e-02 : f32
    %30 = vector.broadcast %cst_15 : f32 to vector<32x128xf32>
    %31 = arith.mulf %30, %27 : vector<32x128xf32>
    %32 = arith.mulf %31, %27 : vector<32x128xf32>
    %33 = arith.mulf %32, %27 : vector<32x128xf32>
    %34 = arith.addf %27, %33 : vector<32x128xf32>
    %cst_16 = arith.constant 0.797884583 : f32
    %35 = vector.broadcast %cst_16 : f32 to vector<32x128xf32>
    %36 = arith.mulf %35, %34 : vector<32x128xf32>
    %37 = math.tanh %36 : vector<32x128xf32>
    %cst_17 = arith.constant 1.000000e+00 : f32
    %38 = vector.broadcast %cst_17 : f32 to vector<32x128xf32>
    %39 = arith.addf %38, %37 : vector<32x128xf32>
    %40 = arith.mulf %29, %39 : vector<32x128xf32>
    %41 = arith.truncf %40 : vector<32x128xf32> to vector<32x128xbf16>
    %c0_18 = arith.constant 0 : index
    %c0_19 = arith.constant 0 : index
    %42 = vector.load %arg6[%c0_18, %c0_19] : memref<32x128xbf16, #tpu.memory_space<vmem>>, vector<32x128xbf16>
    tpu.vector_store %arg6[%c0_18, %c0_19], %41 {strides = array<i32>} : memref<32x128xbf16, #tpu.memory_space<vmem>>, vector<32x128xbf16>,
    return
  }
  func.func @transform_0(%arg0: i32) -> (i32, i32) {
    %c0_i32 = arith.constant 0 : i32
    %c0_i32_0 = arith.constant 0 : i32
    return %arg0, %c0_i32 : i32, i32
  }
  func.func @transform_1(%arg0: i32) -> (i32, i32) {
    %c0_i32 = arith.constant 0 : i32
    %c0_i32_0 = arith.constant 0 : i32
    %c0_i32_1 = arith.constant 0 : i32
    return %c0_i32, %c0_i32_0 : i32, i32
  }
  func.func @transform_2(%arg0: i32) -> (i32, i32) {
    %c0_i32 = arith.constant 0 : i32
    %c0_i32_0 = arith.constant 0 : i32
    %c0_i32_1 = arith.constant 0 : i32
    return %c0_i32, %c0_i32_0 : i32, i32
  }
  func.func @transform_3(%arg0: i32) -> (i32, i32) {
    %c0_i32 = arith.constant 0 : i32
    %c0_i32_0 = arith.constant 0 : i32
    %c0_i32_1 = arith.constant 0 : i32
    return %c0_i32, %c0_i32_0 : i32, i32
  }
  func.func @transform_4(%arg0: i32) -> (i32, i32) {
    %c0_i32 = arith.constant 0 : i32
    %c0_i32_0 = arith.constant 0 : i32
    %c0_i32_1 = arith.constant 0 : i32
    return %c0_i32, %c0_i32_0 : i32, i32
  }
  func.func @transform_5(%arg0: i32) -> (i32, i32) {
    %c0_i32 = arith.constant 0 : i32
    %c0_i32_0 = arith.constant 0 : i32
    return %arg0, %c0_i32 : i32, i32
  }
}

</mosaic_0001>

<bundles_post_ra>
// kernel: tpu_custom_call.1
= control target key start
LH: loop header
LB: loop body
LE: loop exit
PB: predicated region body
PF: predicated region fallthrough
CT: control target
= control target key end

     0   :  { %10 = vsyncpa [#allocation3], 0  ;;  %s853_s0 = inlined_call_operand.hbm [shape: bf16[32,384], index: 0, kind: input, shape index: {}]   ;;  %s854_s1 = inlined_call_operand.hbm [shape: bf16[384,128], index: 1, kind: input, shape index: {}]   ;;  %s855_s2 = inlined_call_operand.vmem [shape: f32[1,128], index: 2, kind: input, shape index: {}]   ;;  %s856_s3 = inlined_call_operand.vmem [shape: f32[1,128], index: 3, kind: input, shape index: {}]   ;;  %s857_s4 = inlined_call_operand.vmem [shape: f32[1,128], index: 4, kind: input, shape index: {}]   ;;  %s858_s5 = inlined_call_operand.hbm [shape: bf16[32,128], index: 5, kind: output, shape index: {}]  }
   0x1   :  { %11 = vsyncpa [#allocation6], 0 }
   0x2   :  { %12 = vsyncpa [#allocation4], 0  ;;  %s765_s18 = smov [#allocation2]   ;;  %s693_s22 = scalar_lea.hbm %s853_s0, 768 }
   0x3   :  { %s18_s19 = sshll.u32 %s765_s18, 4  ;;  %p694_p0 = scmp.ne.s32.totalorder %s853_s0, %s693_s22  ;;  %s19_s19 = int_to_ptr.vmem [resolvable:$true] %s18_s19 }
   0x4   :  { %p697_p1 = scmp.lt.u32.totalorder %s693_s22, %s853_s0 }
   0x6   :  { %p699_p2 = pnand %p697_p1, %p694_p0 }
   0x8   :  { %702 = shalt.err (!%p699_p2)
}
   0x9   :  { %s703_s27 = scalar_lea.vmem %s19_s19, 768  ;;  %p708_p4 = scmp.lt.s32.totalorder %s19_s19, %s19_s19 }
   0xa   :  { %p704_p3 = scmp.ne.s32.totalorder %s19_s19, %s703_s27  ;;  %p709_p5 = scmp.lt.s32.totalorder %s703_s27, %s703_s27 }
   0xc   :  { %p710_p6 = por %p709_p5, %p708_p4 }
   0xe   :  { %p711_p7 = pnand %p710_p6, %p704_p3 }
  0x10   :  { %714 = shalt.err (!%p711_p7)
}
  0x11   :  { %s766_s28 = smov 192   ;;  %s767_s29 = smov 12  }
  0x12   :  { %24 = dma.hbm_to_vmem [thread:$0]  %s853_s0, 768, %s19_s19, [#allocation3], %s766_s28, %s766_s28, %s767_s29  }
  0x13   :  { %s768_s7 = smov [#allocation5]   ;;  %s715_s11 = scalar_lea.hbm %s854_s1, 3072 }
  0x14   :  { %s30_s8 = sshll.u32 %s768_s7, 4  ;;  %p716_p8 = scmp.ne.s32.totalorder %s854_s1, %s715_s11  ;;  %s31_s8 = int_to_ptr.vmem [resolvable:$true] %s30_s8 }
  0x15   :  { %p719_p9 = scmp.lt.u32.totalorder %s715_s11, %s854_s1 }
  0x17   :  { %p721_p10 = pnand %p719_p9, %p716_p8 }
  0x19   :  { %724 = shalt.err (!%p721_p10)
}
  0x1a   :  { %s725_s16 = scalar_lea.vmem %s31_s8, 3072  ;;  %p730_p12 = scmp.lt.s32.totalorder %s31_s8, %s31_s8 }
  0x1b   :  { %p726_p11 = scmp.ne.s32.totalorder %s31_s8, %s725_s16  ;;  %p731_p13 = scmp.lt.s32.totalorder %s725_s16, %s725_s16 }
  0x1d   :  { %p732_p0 = por %p731_p13, %p730_p12 }
  0x1f   :  { %p733_p1 = pnand %p732_p0, %p726_p11 }
  0x21   :  { %736 = shalt.err (!%p733_p1)
}
  0x22   :  { %s769_s0 = smov 64   ;;  %s770_s17 = smov 4  }
  0x23   :  { %36 = dma.hbm_to_vmem [thread:$0]  %s854_s1, 3072, %s31_s8, [#allocation6], %s769_s0, %s769_s0, %s770_s17  }
  0x24   :  { %759 = dma.done.wait [#allocation3], 768  }
  0x25   :  { %760 = vsyncadd [#allocation3], 4294966528 }
  0x26   :  { %761 = dma.done.wait [#allocation6], 3072  }
  0x27   :  { %762 = vsyncadd [#allocation6], 4294964224  ;;  %v645_v0 = vld [vmem:[#allocation5 + $0x40] sm:$0xff]   ;;  %v647_v2 = vld [vmem:[#allocation5 + $0x48] sm:$0xff]  }
  0x28   :  { %v646_v1 = vld [vmem:[#allocation5] sm:$0xff]   ;;  %580 = vmatprep.subr.bf16.mxu0 %v645_v0  ;;  %v649_v4 = vld [vmem:[#allocation5 + $0x8] sm:$0xff]   ;;  %v650_v5 = vld [vmem:[#allocation5 + $0x50] sm:$0xff]  }
  0x29   :  { %581 = vmatpush3.bf16.msra.mxu0 %v646_v1  ;;  %v648_v3 = vld [vmem:[#allocation5 + $0x80] sm:$0xff]   ;;  %v651_v6 = vld [vmem:[#allocation5 + $0x88] sm:$0xff]   ;;  %v652_v7 = vld [vmem:[#allocation5 + $0x10] sm:$0xff]  }
  0x2a   :  { %582 = vmatprep.subr.bf16.mxu0 %v647_v2  ;;  %618 = vmatprep.subr.bf16.mxu1 %v648_v3  ;;  %v653_v8 = vld [vmem:[#allocation5 + $0x58] sm:$0xff]   ;;  %v654_v9 = vld [vmem:[#allocation5 + $0x90] sm:$0xff]   ;;  %v656_v11 = vld [vmem:[#allocation5 + $0x60] sm:$0xff]  }
  0x2b   :  { %619 = vmatpush3.bf16.msra.mxu1 %v648_v3  ;;  %v655_v10 = vld [vmem:[#allocation5 + $0x18] sm:$0xff]   ;;  %v658_v13 = vld [vmem:[#allocation5 + $0x20] sm:$0xff]   ;;  %v659_v15 = vld [vmem:[#allocation5 + $0x68] sm:$0xff]  }
  0x2c   :  { %620 = vmatprep.subr.bf16.mxu1 %v651_v6  ;;  %v657_v12 = vld [vmem:[#allocation5 + $0x98] sm:$0xff]   ;;  %v660_v14 = vld [vmem:[#allocation5 + $0xa0] sm:$0xff]   ;;  %v661_v16 = vld [vmem:[#allocation5 + $0x28] sm:$0xff]  }
  0x2d   :  { %583 = vmatpush3.bf16.msra.mxu0 %v649_v4  ;;  %v663_v17 = vld [vmem:[#allocation5 + $0xa8] sm:$0xff]   ;;  %v662_v18 = vld [vmem:[#allocation5 + $0x70] sm:$0xff]   ;;  %v665_v20 = vld [vmem:[#allocation5 + $0x78] sm:$0xff]  }
  0x2e   :  { %584 = vmatprep.subr.bf16.mxu0 %v650_v5  ;;  %v664_v19 = vld [vmem:[#allocation5 + $0x30] sm:$0xff]   ;;  %v667_v23 = vld [vmem:[#allocation5 + $0x38] sm:$0xff]  }
  0x2f   :  { %621 = vmatpush3.bf16.msra.mxu1 %v651_v6  ;;  %v666_v21 = vld [vmem:[#allocation5 + $0xb0] sm:$0xff]   ;;  %v672_v24 = vld [vmem:[#allocation2 + $0x8] ss:$12 sps:$4 sm:$0xff]  }
  0x30   :  { %622 = vmatprep.subr.bf16.mxu1 %v654_v9  ;;  %v670_v22 = vld [vmem:[#allocation2 + $0x4] ss:$12 sps:$4 sm:$0xff]   ;;  %v671_v25 = vld [vmem:[#allocation5 + $0xb8] sm:$0xff]   ;;  %634 = vmatprep.mubr.bf16.mxu1 %v672_v24  ;;  %v528_v32 = vld [vmem:[%s855_s2] ss:$0 sm:$0xff] }
  0x31   :  { %585 = vmatpush3.bf16.msra.mxu0 %v652_v7  ;;  %321 = vmatprep.mubr.bf16.mxu0 %v670_v22  ;;  %v668_v26 = vld [vmem:[#allocation2] ss:$12 sps:$4 sm:$0xff]   ;;  %v674_v27 = vld [vmem:[#allocation2 + $0x1c] ss:$12 sps:$4 sm:$0xff]   ;;  %v676_v29 = vld [vmem:[#allocation2 + $0x18] ss:$12 sps:$4 sm:$0xff]  }
  0x32   :  { %586 = vmatprep.subr.bf16.mxu0 %v653_v8  ;;  %v673_v28 = vld [vmem:[#allocation2 + $0x20] ss:$12 sps:$4 sm:$0xff]  }
  0x33   :  { %623 = vmatpush3.bf16.msra.mxu1 %v654_v9  ;;  %v560_v22 = vld [vmem:[%s857_s4] ss:$0 sm:$0xff] }
  0x34   :  { %624 = vmatprep.subr.bf16.mxu1 %v657_v12 }
  0x35   :  { %587 = vmatpush3.bf16.msra.mxu0 %v655_v10 }
  0x36   :  { %588 = vmatprep.subr.bf16.mxu0 %v656_v11 }
  0x37   :  { %625 = vmatpush3.bf16.msra.mxu1 %v657_v12 }
  0x38   :  { %626 = vmatprep.subr.bf16.mxu1 %v660_v14 }
  0x39   :  { %589 = vmatpush3.bf16.msra.mxu0 %v658_v13 }
  0x3a   :  { %590 = vmatprep.subr.bf16.mxu0 %v659_v15 }
  0x3b   :  { %627 = vmatpush3.bf16.msra.mxu1 %v660_v14 }
  0x3c   :  { %628 = vmatprep.subr.bf16.mxu1 %v663_v17 }
  0x3d   :  { %591 = vmatpush3.bf16.msra.mxu0 %v661_v16 }
  0x3e   :  { %592 = vmatprep.subr.bf16.mxu0 %v662_v18 }
  0x3f   :  { %629 = vmatpush3.bf16.msra.mxu1 %v663_v17 }
  0x40   :  { %630 = vmatprep.subr.bf16.mxu1 %v666_v21 }
  0x41   :  { %593 = vmatpush3.bf16.msra.mxu0 %v664_v19  ;;  %v559_v19 = vld [vmem:[%s856_s3] ss:$0 sm:$0xff]  ;;  %s771_s3 = smov [#allocation7]  }
  0x42   :  { %594 = vmatprep.subr.bf16.mxu0 %v665_v20  ;;  %s515_s4 = sshll.u32 %s771_s3, 4  ;;  %s516_s4 = int_to_ptr.vmem [resolvable:$true] %s515_s4 }
  0x43   :  { %631 = vmatpush3.bf16.msra.mxu1 %v666_v21  ;;  %s737_s24 = scalar_lea.vmem %s516_s4, 256  ;;  %p742_p3 = scmp.lt.s32.totalorder %s516_s4, %s516_s4 }
  0x44   :  { %632 = vmatprep.subr.bf16.mxu1 %v671_v25  ;;  %p738_p2 = scmp.ne.s32.totalorder %s516_s4, %s737_s24  ;;  %p743_p4 = scmp.lt.s32.totalorder %s737_s24, %s737_s24 }
  0x45   :  { %595 = vmatpush3.bf16.msra.mxu0 %v667_v23 }
  0x46   :  { %p744_p5 = por %p743_p4, %p742_p3 }
  0x47   :  { %633 = vmatpush3.bf16.msra.mxu1 %v671_v25 }
  0x48   :  { %322 = vmatmul.mubr.bf16.vlgmr.msra.gmra.mrb[0].mxu0 %v668_v26  ;;  %p745_p6 = pnand %p744_p5, %p738_p2 }
  0x49   :  { %329 = vmatprep.mubr.bf16.mxu0 %v674_v27 }
  0x4a   :  { %635 = vmatmul.mubr.bf16.vlgmr.msra.gmra.mrb[0].mxu1 %v673_v28 }
  0x50   :  { %330 = vmatmul.mubr.bf16.gmra.mrb[4].mxu0 %v676_v29 }
 0x11b   :  { %v596_v30 = vpop.f32.mrb[0].mxu0 }
 0x11c   :  { %v597_v31 = vpop.f32.mrb[1].mxu0 }
 0x11d   :  { %v598_v33 = vadd.f32 %v597_v31, %v596_v30  ;;  %v599_v34 = vpop.f32.mrb[2].mxu0  ;;  %v636_v36 = vpop.f32.mrb[0].mxu1 }
 0x11e   :  { %v600_v35 = vpop.f32.mrb[3].mxu0  ;;  %v372_v39 = vpop.f32.mrb[1].mxu1 }
 0x11f   :  { %v601_v37 = vadd.f32 %v600_v35, %v599_v34  ;;  %v324_v38 = vadd.f32 %v598_v33, %v528_v32  ;;  %v637_v40 = vpop.f32.mrb[2].mxu1 }
 0x120   :  { %v375_v43 = vpop.f32.mrb[3].mxu1 }
 0x121   :  { %v373_v41 = vadd.f32 %v372_v39, %v324_v38  ;;  %v327_v42 = vadd.f32 %v601_v37, %v528_v32 }
 0x123   :  { %v376_v44 = vadd.f32 %v375_v43, %v327_v42  ;;  %v602_v45 = vpop.f32.mrb[4].mxu0  ;;  %389 = vadd.xlane.f32.xlu0 %v373_v41 }
 0x124   :  { %v603_v46 = vpop.f32.mrb[5].mxu0 }
 0x125   :  { %v604_v47 = vadd.f32 %v603_v46, %v602_v45  ;;  %v605_v48 = vpop.f32.mrb[6].mxu0 }
 0x126   :  { %v606_v49 = vpop.f32.mrb[7].mxu0 }
 0x127   :  { %v332_v50 = vadd.f32 %v604_v47, %v528_v32  ;;  %v607_v51 = vadd.f32 %v606_v49, %v605_v48  ;;  %391 = vadd.xlane.f32.xlu0 %v376_v44 }
 0x129   :  { %v335_v52 = vadd.f32 %v607_v51, %v528_v32  ;;  %v381_v53 = vadd.f32 %v636_v36, %v332_v50 }
 0x12b   :  { %393 = vadd.xlane.f32.xlu1 %v381_v53  ;;  %v384_v54 = vadd.f32 %v637_v40, %v335_v52 }
 0x12f   :  { %395 = vadd.xlane.f32.xlu1 %v384_v54 }
 0x1b0   :  { %v390_v55 = vpop.xlane.xlu0 %389 }
 0x1b1   :  { %v398_v56 = vmul.f32 0.0078125, %v390_v55 }
 0x1b3   :  { %v402_v57 = vsub.f32 %v373_v41, %v398_v56 }
 0x1b4   :  { %v392_v58 = vpop.xlane.xlu0 %391 }
 0x1b5   :  { %v399_v59 = vmul.f32 0.0078125, %v392_v58  ;;  %v406_v60 = vmul.f32 %v402_v57, %v402_v57 }
 0x1b7   :  { %v403_v61 = vsub.f32 %v376_v44, %v399_v59  ;;  %410 = vadd.xlane.f32.xlu0 %v406_v60 }
 0x1b8   :  { %v394_v62 = vpop.xlane.xlu1 %393 }
 0x1b9   :  { %v400_v63 = vmul.f32 0.0078125, %v394_v62  ;;  %v407_v0 = vmul.f32 %v403_v61, %v403_v61 }
 0x1bb   :  { %v404_v1 = vsub.f32 %v381_v53, %v400_v63  ;;  %412 = vadd.xlane.f32.xlu1 %v407_v0 }
 0x1bc   :  { %v396_v2 = vpop.xlane.xlu1 %395 }
 0x1bd   :  { %v401_v3 = vmul.f32 0.0078125, %v396_v2  ;;  %v408_v4 = vmul.f32 %v404_v1, %v404_v1 }
 0x1bf   :  { %v405_v5 = vsub.f32 %v384_v54, %v401_v3  ;;  %414 = vadd.xlane.f32.xlu0 %v408_v4 }
 0x1c1   :  { %v409_v6 = vmul.f32 %v405_v5, %v405_v5 }
 0x1c3   :  { %416 = vadd.xlane.f32.xlu1 %v409_v6 }
 0x244   :  { %v411_v7 = vpop.xlane.xlu0 %410 }
 0x245   :  { %v418_v8 = vmul.f32 0.0078125, %v411_v7 }
 0x247   :  { %v422_v9 = vadd.f32 1e-05, %v418_v8 }
 0x248   :  { %v413_v10 = vpop.xlane.xlu1 %412 }
 0x249   :  { %677 = vrsqrt.f32 %v422_v9  ;;  %v419_v11 = vmul.f32 0.0078125, %v413_v10 }
 0x24b   :  { %v423_v12 = vadd.f32 1e-05, %v419_v11 }
 0x24c   :  { %v415_v13 = vpop.xlane.xlu0 %414 }
 0x24d   :  { %679 = vrsqrt.f32 %v423_v12  ;;  %v420_v14 = vmul.f32 0.0078125, %v415_v13 }
 0x24f   :  { %v424_v15 = vadd.f32 1e-05, %v420_v14 }
 0x250   :  { %v417_v16 = vpop.xlane.xlu1 %416 }
 0x251   :  { %681 = vrsqrt.f32 %v424_v15  ;;  %v421_v17 = vmul.f32 0.0078125, %v417_v16 }
 0x253   :  { %v678_v18 = vpop.eup %677  ;;  %v425_v20 = vadd.f32 1e-05, %v421_v17 }
 0x254   :  { %v430_v21 = vmul.f32 %v678_v18, %v402_v57 }
 0x255   :  { %683 = vrsqrt.f32 %v425_v20 }
 0x256   :  { %v440_v23 = vmul.f32 %v559_v19, %v430_v21 }
 0x257   :  { %v680_v24 = vpop.eup %679 }
 0x258   :  { %v450_v25 = vadd.f32 %v560_v22, %v440_v23  ;;  %v431_v26 = vmul.f32 %v680_v24, %v403_v61 }
 0x25a   :  { %v441_v27 = vmul.f32 %v559_v19, %v431_v26  ;;  %v458_v28 = vmul.f32 0.044715, %v450_v25  ;;  %v454_v60 = vmul.f32 0.5, %v450_v25 }
 0x25b   :  { %v682_v29 = vpop.eup %681 }
 0x25c   :  { %v451_v30 = vadd.f32 %v560_v22, %v441_v27  ;;  %v432_v31 = vmul.f32 %v682_v29, %v404_v1  ;;  %v462_v32 = vmul.f32 %v458_v28, %v450_v25 }
 0x25e   :  { %v442_v33 = vmul.f32 %v559_v19, %v432_v31  ;;  %v459_v34 = vmul.f32 0.044715, %v451_v30  ;;  %v466_v35 = vmul.f32 %v462_v32, %v450_v25  ;;  %v455_v61 = vmul.f32 0.5, %v451_v30 }
 0x25f   :  { %v684_v36 = vpop.eup %683 }
 0x260   :  { %v452_v37 = vadd.f32 %v560_v22, %v442_v33  ;;  %v433_v38 = vmul.f32 %v684_v36, %v405_v5  ;;  %v463_v39 = vmul.f32 %v459_v34, %v451_v30  ;;  %v470_v40 = vadd.f32 %v466_v35, %v450_v25 }
 0x262   :  { %v443_v41 = vmul.f32 %v559_v19, %v433_v38  ;;  %v460_v42 = vmul.f32 0.044715, %v452_v37  ;;  %v467_v43 = vmul.f32 %v463_v39, %v451_v30  ;;  %v474_v44 = vmul.f32 0.7978846, %v470_v40 }
 0x263   :  { %v456_v5 = vmul.f32 0.5, %v452_v37 }
 0x264   :  { %v453_v45 = vadd.f32 %v560_v22, %v443_v41  ;;  %v464_v46 = vmul.f32 %v460_v42, %v452_v37  ;;  %v471_v47 = vadd.f32 %v467_v43, %v451_v30  ;;  %685 = vtanh.f32 %v474_v44 }
 0x266   :  { %v461_v48 = vmul.f32 0.044715, %v453_v45  ;;  %v468_v49 = vmul.f32 %v464_v46, %v452_v37  ;;  %v475_v50 = vmul.f32 0.7978846, %v471_v47  ;;  %v457_v6 = vmul.f32 0.5, %v453_v45 }
 0x268   :  { %v465_v51 = vmul.f32 %v461_v48, %v453_v45  ;;  %v472_v52 = vadd.f32 %v468_v49, %v452_v37  ;;  %687 = vtanh.f32 %v475_v50 }
 0x26a   :  { %v469_v53 = vmul.f32 %v465_v51, %v453_v45  ;;  %v476_v54 = vmul.f32 0.7978846, %v472_v52 }
 0x26c   :  { %v473_v55 = vadd.f32 %v469_v53, %v453_v45  ;;  %689 = vtanh.f32 %v476_v54 }
 0x26e   :  { %v477_v56 = vmul.f32 0.7978846, %v473_v55  ;;  %v686_v57 = vpop.eup %685 }
 0x26f   :  { %v482_v58 = vadd.f32 1.0, %v686_v57 }
 0x270   :  { %691 = vtanh.f32 %v477_v56 }
 0x271   :  { %v486_v63 = vmul.f32 %v482_v58, %v454_v60 }
 0x272   :  { %v688_v59 = vpop.eup %687 }
 0x273   :  { %v483_v62 = vadd.f32 1.0, %v688_v59 }
 0x275   :  { %v487_v0 = vmul.f32 %v483_v62, %v455_v61 }
 0x276   :  { %v690_v1 = vpop.eup %689 }
 0x277   :  { %v572_v2 = vpack.c.bf16 %v487_v0, %v486_v63  ;;  %v484_v3 = vadd.f32 1.0, %v690_v1 }
 0x279   :  { %573 = vst [vmem:[#allocation7] sm:$0xff] %v572_v2   ;;  %v488_v8 = vmul.f32 %v484_v3, %v456_v5 }
 0x27a   :  { %v692_v4 = vpop.eup %691 }
 0x27b   :  { %v485_v7 = vadd.f32 1.0, %v692_v4 }
 0x27d   :  { %v489_v9 = vmul.f32 %v485_v7, %v457_v6 }
 0x27f   :  { %v577_v10 = vpack.c.bf16 %v489_v9, %v488_v8 }
 0x281   :  { %579 = vst [vmem:[#allocation7 + $0x8] sm:$0xff] %v577_v10  }
 0x282   :  { %748 = shalt.err (!%p745_p6)
}
 0x283   :  { %s749_s27 = scalar_lea.hbm %s858_s5, 256 }
 0x284   :  { %p750_p7 = scmp.ne.s32.totalorder %s858_s5, %s749_s27  ;;  %p753_p8 = scmp.lt.u32.totalorder %s749_s27, %s858_s5 }
 0x286   :  { %p755_p9 = pnand %p753_p8, %p750_p7 }
 0x288   :  { %758 = shalt.err (!%p755_p9)
}
 0x289   :  { %521 = dma.vmem_to_hbm [thread:$0]  %s516_s4, 256, %s858_s5, [#allocation4], %s769_s0, %s769_s0, %s770_s17  }
 0x28a   :  { %763 = dma.done.wait [#allocation4], 256  }
 0x28b   :  { %764 = vsyncadd [#allocation4], 4294967040 }
 0x28c   :  { %525 = vsyncpa [#allocation3], 1 }
 0x28d   :  { %526 = vsyncpa [#allocation6], 1 }
 0x28e   :  { %527 = vsyncpa [#allocation4], 1 }

</bundles_post_ra>
